<compile_context>
chip_gen: v7x
topology: tpu7x:2x2x1
jax: 0.10.0
libtpu: 0.0.40
codegen_flags: <defaults>
</compile_context>

<pallas_src>
import math

import numpy as np
import jax
import jax.numpy as jnp
from jax.experimental import pallas as pl
from jax.experimental.pallas import tpu as pltpu


def _pascal_row(kernel_size: int) -> np.ndarray:
    """Normalized 1-D binomial factor; outer(row, row) == get_pascal_kernel_2d(norm=True)."""
    row = np.array([math.comb(kernel_size - 1, k) for k in range(kernel_size)],
                   dtype=np.float64)
    return row / row.sum()


def _blur_stride_matrix(n_in, n_out, ks, stride, pad, row) -> np.ndarray:
    """m[o, i] = row[k] where i == stride*o + k - pad; taps outside [0, n_in) are
    dropped, which reproduces the zero padding of the reference depthwise conv."""
    m = np.zeros((n_out, n_in), dtype=np.float64)
    for o in range(n_out):
        for k in range(ks):
            i = stride * o + k - pad
            if 0 <= i < n_in:
                m[o, i] += row[k]
    return m


def _make_kernel(mps, mxu_dtype, dims):
    Hp, Wp = dims

    def kernel(a_ref, b_ref, x_ref, o_ref):
        x = x_ref[0]                                      # [Cb, H, W], input dtype

        # 1) max_pool2d(kernel=mps, stride=1, pad=0), separable, in input dtype
        #    (W direction = lane-shifted taps, H direction = sublane-shifted taps).
        xw = x[:, :, 0:Wp]
        for d in range(1, mps):
            xw = jnp.maximum(xw, x[:, :, d:d + Wp])
        mp = xw[:, 0:Hp, :]
        for d in range(1, mps):
            mp = jnp.maximum(mp, xw[:, d:d + Hp, :])      # [Cb, Hp, Wp]

        # 2) pascal blur + stride-s subsample folded into the resident banded
        #    matrices; two channel-batched MXU contractions, f32 accumulation.
        mp_m = mp.astype(mxu_dtype)
        t = jnp.einsum('chw,cwo->cho', mp_m, b_ref[...],
                       preferred_element_type=jnp.float32)      # [Cb, Hp, Wo]
        out = jnp.einsum('coh,chw->cow', a_ref[...], t.astype(mxu_dtype),
                         preferred_element_type=jnp.float32)    # [Cb, Ho, Wo]

        # 3) single store of the whole output block.
        o_ref[0] = out.astype(o_ref.dtype)

    return kernel


def max_blur_pool2d(x, kernel_size=3, stride=2, max_pool_size=2, ceil_mode=False):
    # ceil_mode only affects the max pool, which runs with stride=1 here -> no-op.
    B, C, H, W = x.shape
    ks, mps, s = int(kernel_size), int(max_pool_size), int(stride)
    p = (ks - 1) // 2
    assert H >= mps and W >= mps, "input smaller than max_pool_size"
    Hp, Wp = H - mps + 1, W - mps + 1
    Ho = (Hp + 2 * p - ks) // s + 1
    Wo = (Wp + 2 * p - ks) // s + 1
    assert Ho > 0 and Wo > 0, "degenerate output shape"

    # MXU feed dtype: bf16 for half-precision inputs (v6e/v7x fast path),
    # f32 otherwise (keeps the 1e-5 reference match for f32 inputs).
    half = jnp.issubdtype(x.dtype, jnp.floating) and x.dtype.itemsize <= 2
    mxu_dt = jnp.bfloat16 if half else jnp.float32
    isz = x.dtype.itemsize
    msz = np.dtype(mxu_dt).itemsize
    osz = isz

    # --- per-generation VMEM accounting ------------------------------------
    try:
        info = pltpu.get_tpu_info()
        vmem_phys = int(getattr(info, "vmem_capacity_bytes", 0)) or (64 << 20)
    except Exception:
        vmem_phys = 64 << 20                      # conservative (v7x per-core)
    vmem_limit = min(vmem_phys * 3 // 4, 112 << 20)
    budget = int(vmem_limit * 0.55)               # live-footprint target

    # Live bytes per channel inside one grid step (x2 = double-buffered blocks).
    per_chan = (
        2 * H * W * isz                           # input block (double buffered)
        + H * Wp * isz                            # xw (W-direction max)
        + Hp * Wp * isz                           # mp
        + (Hp * Wp * msz if msz != isz else 0)    # mp cast for the MXU
        + 2 * Wp * Wo * msz                       # resident W-side weights (x2)
        + 2 * Ho * Hp * msz                       # resident H-side weights (x2)
        + Hp * Wo * 4 + Hp * Wo * msz             # t (f32 acc) + cast
        + Ho * Wo * 4                             # f32 result
        + 2 * Ho * Wo * osz                       # output block (double buffered)
    )
    Cb = int(max(1, min(C, budget // max(1, per_chan))))

    # Keep enough grid steps for double-buffering and both v7x TensorCores.
    min_steps = 8
    if B * pl.cdiv(C, Cb) < min_steps and C > 1:
        want_blocks = min(C, pl.cdiv(min_steps, B))
        Cb = max(1, pl.cdiv(C, want_blocks))
    n_cblk = pl.cdiv(C, Cb)

    # --- blur + stride weights, built once on the host ----------------------
    row = _pascal_row(ks)
    a_np = _blur_stride_matrix(Hp, Ho, ks, s, p, row)        # [Ho, Hp]
    b_np = _blur_stride_matrix(Wp, Wo, ks, s, p, row).T      # [Wp, Wo]
    a_b = jnp.asarray(np.ascontiguousarray(np.broadcast_to(a_np[None], (Cb, Ho, Hp))),
                      dtype=mxu_dt)
    b_b = jnp.asarray(np.ascontiguousarray(np.broadcast_to(b_np[None], (Cb, Wp, Wo))),
                      dtype=mxu_dt)

    kernel = _make_kernel(mps, mxu_dt, (Hp, Wp))

    return pl.pallas_call(
        kernel,
        out_shape=jax.ShapeDtypeStruct((B, C, Ho, Wo), x.dtype),
        grid_spec=pltpu.PrefetchScalarGridSpec(
            num_scalar_prefetch=0,
            grid=(B, n_cblk),
            in_specs=[
                # Constant block index -> fetched once, kept resident in VMEM.
                pl.BlockSpec((Cb, Ho, Hp), lambda b, c: (0, 0, 0)),
                pl.BlockSpec((Cb, Wp, Wo), lambda b, c: (0, 0, 0)),
                pl.BlockSpec((1, Cb, H, W), lambda b, c: (b, c, 0, 0)),
            ],
            out_specs=pl.BlockSpec((1, Cb, Ho, Wo), lambda b, c: (b, c, 0, 0)),
        ),
        compiler_params=pltpu.CompilerParams(
            dimension_semantics=("parallel", "parallel"),
            vmem_limit_bytes=int(vmem_limit),
        ),
    )(a_b, b_b, x)


def _reference(x, kernel_size, stride, max_pool_size):
    """Pure-JAX reference mirroring the PyTorch module."""
    C = x.shape[1]
    p = (kernel_size - 1) // 2
    mp = jax.lax.reduce_window(
        x, -jnp.inf, jax.lax.max,
        (1, 1, max_pool_size, max_pool_size), (1, 1, 1, 1), "VALID",
    )
    r = _pascal_row(kernel_size)
    w2d = np.outer(r, r).astype(np.float32)         # normalized pascal 2D kernel
    w = jnp.tile(jnp.asarray(w2d)[None, None], (C, 1, 1, 1))   # [C, 1, ks, ks]
    return jax.lax.conv_general_dilated(
        mp, w.astype(x.dtype),
        window_strides=(stride, stride),
        padding=((p, p), (p, p)),
        dimension_numbers=("NCHW", "OIHW", "NCHW"),
        feature_group_count=C,
    )


if __name__ == "__main__":
    key = jax.random.PRNGKey(0)
    x = jax.random.normal(key, (2, 4, 16, 16), dtype=jnp.float32)

    y = max_blur_pool2d(x, kernel_size=3, stride=2, max_pool_size=2, ceil_mode=False)
    y = jax.block_until_ready(y)

    assert y.shape == (2, 4, 8, 8), y.shape
    y_ref = _reference(x, kernel_size=3, stride=2, max_pool_size=2)
    assert np.allclose(np.asarray(y), np.asarray(y_ref), atol=1e-5, rtol=1e-5)

    print("KERNEL_OK")
</pallas_src>

<mosaic_0001>
module attributes {stable_mosaic.version = 11 : i64} {
  func.func @kernel(%arg0: i32, %arg1: i32, %arg2: memref<1x8x15xf32, #tpu.memory_space<vmem>>, %arg3: memref<1x15x8xf32, #tpu.memory_space<vmem>>, %arg4: memref<1x1x16x16xf32, #tpu.memory_space<vmem>>, %arg5: memref<1x1x8x8xf32, #tpu.memory_space<vmem>>) attributes {dimension_semantics = [#tpu.dimension_semantics<parallel>, #tpu.dimension_semantics<parallel>], iteration_bounds = array<i64: 2, 4>, scalar_prefetch = 0 : i64, scratch_operands = 0 : i64, tpu.core_type = #tpu.core_type<tc>, window_params = [{pipeline_mode = #tpu.pipeline_mode<synchronous>, transform_indices = @transform_0, window_bounds = array<i64: 1, 8, 15>}, {pipeline_mode = #tpu.pipeline_mode<synchronous>, transform_indices = @transform_1, window_bounds = array<i64: 1, 15, 8>}, {transform_indices = @transform_2, window_bounds = array<i64: 1, 1, 16, 16>}, {transform_indices = @transform_3, window_bounds = array<i64: 1, 1, 8, 8>}]} {
    %c0 = arith.constant 0 : index
    %c0_0 = arith.constant 0 : index
    %c0_1 = arith.constant 0 : index
    %c0_2 = arith.constant 0 : index
    %0 = vector.load %arg4[%c0, %c0_0, %c0_1, %c0_2] : memref<1x1x16x16xf32, #tpu.memory_space<vmem>>, vector<1x1x16x16xf32>
    %1 = vector.shape_cast %0 : vector<1x1x16x16xf32> to vector<1x16x16xf32>
    %2 = vector.extract_strided_slice %1 {offsets = [0, 0, 0], sizes = [1, 16, 15], strides = [1, 1, 1]} : vector<1x16x16xf32> to vector<1x16x15xf32>
    %3 = vector.extract_strided_slice %1 {offsets = [0, 0, 1], sizes = [1, 16, 15], strides = [1, 1, 1]} : vector<1x16x16xf32> to vector<1x16x15xf32>
    %4 = arith.maximumf %2, %3 : vector<1x16x15xf32>
    %5 = vector.extract_strided_slice %4 {offsets = [0, 0, 0], sizes = [1, 15, 15], strides = [1, 1, 1]} : vector<1x16x15xf32> to vector<1x15x15xf32>
    %6 = vector.extract_strided_slice %4 {offsets = [0, 1, 0], sizes = [1, 15, 15], strides = [1, 1, 1]} : vector<1x16x15xf32> to vector<1x15x15xf32>
    %7 = arith.maximumf %5, %6 : vector<1x15x15xf32>
    %c0_3 = arith.constant 0 : index
    %c0_4 = arith.constant 0 : index
    %c0_5 = arith.constant 0 : index
    %8 = vector.load %arg3[%c0_3, %c0_4, %c0_5] : memref<1x15x8xf32, #tpu.memory_space<vmem>>, vector<1x15x8xf32>
    "tpu.trace_start"() <{level = 10 : i32, message = "chw,cwo->cho"}> : () -> ()
    %cst = arith.constant dense<0.000000e+00> : vector<1x15x8xf32>
    %9 = tpu.matmul %7, %8, %cst {dimension_numbers = #tpu.dot_dimension_numbers<[2], [1], [1], [2], [0, 0, 0, 1, 1, 2], [0], [0]>} : vector<1x15x15xf32>, vector<1x15x8xf32>, vector<1x15x8xf32> -> vector<1x15x8xf32>
    "tpu.trace_stop"() : () -> ()
    %c0_6 = arith.constant 0 : index
    %c0_7 = arith.constant 0 : index
    %c0_8 = arith.constant 0 : index
    %10 = vector.load %arg2[%c0_6, %c0_7, %c0_8] : memref<1x8x15xf32, #tpu.memory_space<vmem>>, vector<1x8x15xf32>
    "tpu.trace_start"() <{level = 10 : i32, message = "coh,chw->cow"}> : () -> ()
    %cst_9 = arith.constant dense<0.000000e+00> : vector<1x8x8xf32>
    %11 = tpu.matmul %10, %9, %cst_9 {dimension_numbers = #tpu.dot_dimension_numbers<[2], [1], [1], [2], [0, 0, 0, 1, 1, 2], [0], [0]>} : vector<1x8x15xf32>, vector<1x15x8xf32>, vector<1x8x8xf32> -> vector<1x8x8xf32>
    "tpu.trace_stop"() : () -> ()
    %c0_10 = arith.constant 0 : index
    %c0_11 = arith.constant 0 : index
    %c0_12 = arith.constant 0 : index
    %c0_13 = arith.constant 0 : index
    %12 = vector.load %arg5[%c0_10, %c0_11, %c0_12, %c0_13] : memref<1x1x8x8xf32, #tpu.memory_space<vmem>>, vector<1x1x8x8xf32>
    %13 = vector.shape_cast %12 : vector<1x1x8x8xf32> to vector<1x8x8xf32>
    %14 = vector.shape_cast %11 : vector<1x8x8xf32> to vector<1x1x8x8xf32>
    tpu.vector_store %arg5[%c0_10, %c0_11, %c0_12, %c0_13], %14 {strides = array<i32>} : memref<1x1x8x8xf32, #tpu.memory_space<vmem>>, vector<1x1x8x8xf32>,
    return
  }
  func.func @transform_0(%arg0: i32, %arg1: i32) -> (i32, i32, i32) {
    %c0_i32 = arith.constant 0 : i32
    %c0_i32_0 = arith.constant 0 : i32
    %c0_i32_1 = arith.constant 0 : i32
    %c0_i32_2 = arith.constant 0 : i32
    return %c0_i32, %c0_i32_0, %c0_i32_1 : i32, i32, i32
  }
  func.func @transform_1(%arg0: i32, %arg1: i32) -> (i32, i32, i32) {
    %c0_i32 = arith.constant 0 : i32
    %c0_i32_0 = arith.constant 0 : i32
    %c0_i32_1 = arith.constant 0 : i32
    %c0_i32_2 = arith.constant 0 : i32
    return %c0_i32, %c0_i32_0, %c0_i32_1 : i32, i32, i32
  }
  func.func @transform_2(%arg0: i32, %arg1: i32) -> (i32, i32, i32, i32) {
    %c0_i32 = arith.constant 0 : i32
    %c0_i32_0 = arith.constant 0 : i32
    %c0_i32_1 = arith.constant 0 : i32
    return %arg0, %arg1, %c0_i32, %c0_i32_0 : i32, i32, i32, i32
  }
  func.func @transform_3(%arg0: i32, %arg1: i32) -> (i32, i32, i32, i32) {
    %c0_i32 = arith.constant 0 : i32
    %c0_i32_0 = arith.constant 0 : i32
    %c0_i32_1 = arith.constant 0 : i32
    return %arg0, %arg1, %c0_i32, %c0_i32_0 : i32, i32, i32, i32
  }
}

</mosaic_0001>

<bundles_post_ra>
// kernel: tpu_custom_call.1
= control target key start
LH: loop header
LB: loop body
LE: loop exit
PB: predicated region body
PF: predicated region fallthrough
CT: control target
= control target key end

     0   :  { %8 = vsyncpa [#allocation3], 0  ;;  %s1008_s0 = inlined_call_operand.vmem [shape: f32[1,8,15], index: 0, kind: input, shape index: {}]   ;;  %s1009_s1 = inlined_call_operand.vmem [shape: f32[1,15,8], index: 1, kind: input, shape index: {}]   ;;  %s1010_s2 = inlined_call_operand.hbm [shape: f32[2,4,16,16], index: 2, kind: input, shape index: {}]   ;;  %s1011_s3 = inlined_call_operand.hbm [shape: f32[2,4,8,8], index: 3, kind: output, shape index: {}]  }
   0x1   :  { %10 = vsyncpa [#allocation3 + $0x1], 0 }
   0x2   :  { %11 = vsyncpa [#allocation4], 0 }
   0x3   :  { %13 = vsyncpa [#allocation4 + $0x1], 0  ;;  %s793_s12 = smov 0   ;;  %s795_s13 = smov 0  }
   0x4   :  { %s797_s14 = smov 0   ;;  %s799_s15 = smov 0  }
   0x5   :  { %s801_s16 = smov 0   ;;  %s803_s17 = smov 0  }
   0x6   :  { %s805_s18 = smov 0   ;;  %s807_s19 = smov 0  }
   0x7 LB: > { %s497_s20 = sadd.s32 4294967295, %s762_s19   ;;  %s498_s21 = sadd.s32 4294967294, %s762_s19   ;;  %s762_s19 = sphi %s807_s19, %s19_s19   ;;  %s758_s18 = sphi %s805_s18, %s1031_s18   ;;  %s754_s17 = sphi %s803_s17, %s1030_s17   ;;  %s750_s16 = sphi %s801_s16, %s1029_s16   ;;  %s746_s15 = sphi %s799_s15, %s1028_s15   ;;  %s742_s14 = sphi %s797_s14, %s1027_s14   ;;  %s738_s13 = sphi %s795_s13, %s1026_s13   ;;  %s734_s12 = sphi %s793_s12, %s1025_s12  }
   0x8   : > { %s28_s22 = sadd.s32 1, %s754_s17  ;;  %s31_s23 = sadd.s32 1, %s758_s18 }
   0x9   : > { %p29_p0 = scmp.ge.s32.totalorder %s28_s22, 4  ;;  %s82_s24 = sadd.s32 1, %s742_s14 }
   0xa   : > { %p89_p1 = scmp.ne.s32.totalorder %s742_s14, %s738_s13  ;;  %p90_p2 = scmp.eq.s32.totalorder %s762_s19, 0 }
   0xb   : > { %s1033_s22 = smov (%p29_p0, %s28_s22), 0  ;;  %s1035_s23 = smov (!%p29_p0, %s31_s23), %s758_s18 }
   0xc   : > { %s78_s25 = ssub.s32 %s754_s17, %s1033_s22  ;;  %p846_p3 = por %p90_p2, %p89_p1 }
   0xd   : > { %p33_p4 = scmp.ge.s32.totalorder %s1035_s23, 2  ;;  %p95_p5 = scmp.ne.s32.totalorder %s738_s13, %s734_s12 }
   0xe   : > { %p96_p6 = scmp.eq.s32.totalorder %s497_s20, 0  ;;  %p121_p7 = scmp.eq.s32.totalorder %s497_s20, 7 }
   0xf   : > { %s1037_s23 = smov (%p33_p4, %s1035_s23), 0  ;;  %p127_p10 = scmp.eq.s32.totalorder %s498_s21, 7 }
  0x10   : > { %1015 = sst [smem:[#allocation8_spill]] %s1037_s23  ;;  %p854_p8 = por %p96_p6, %p95_p5 }
  0x11   : > { %p858_p9 = por %p121_p7, %p89_p1  ;;  %s77_s29 = ssub.s32 %s758_s18, %s1037_s23 }
  0x12   : > { %s79_s30 = sor.u32 %s78_s25, %s77_s29  ;;  %p864_p12 = por %p127_p10, %p95_p5 }
  0x13   : > { %s1017_s28 = scalar_select %p858_p9, 1, 0 }
  0x14   : > { %p80_p11 = scmp.eq.s32.totalorder %s79_s30, 0  ;;  %p561_p13 = scmp.lt.s32.totalorder %s762_s19, 8 }
  0x15   : > { %s1018_s4 = scalar_select %p864_p12, 1, 0 }
  0x16   : > { %s153_s5 = sand.u32 1, %s742_s14   ;;  %s502_s8 = sshll.u32 %s754_s17, 1 }
  0x17   : > { %s871_s6 = scalar_select %p80_p11, %s742_s14, %s82_s24  }
  0x18   : > { %s501_s7 = sshll.u32 %s153_s5, 4  ;;  %s503_s9 = sshll.u32 %s758_s18, 3 }
  0x19   : > { %s157_s10 = scalar_lea.vmem [#allocation2], %s501_s7  ;;  %s163_s20 = sadd.s32 %s503_s9, %s502_s8 }
  0x1a   : > { %s166_s11 = sshll.u32 %s157_s10, 4  ;;  %s504_s23 = sshll.u32 %s163_s20, 7  ;;  %s875_s11 = int_to_ptr.vmem [resolvable:$true] %s166_s11 }
  0x1b   : > { %p879_p0 = pnand %p561_p13, %p846_p3  ;;  %s886_s24 = scalar_lea.hbm %s1010_s2, %s504_s23 }
  0x1c   : > { %s888_s30 = scalar_lea.sflag [#allocation3], %s153_s5  ;;  %s634_s7 = scalar_lea.hbm %s886_s24, 256 }
  0x1d   : > { %p635_p1 = scmp.ne.s32.totalorder %s886_s24, %s634_s7  ;;  %p636_p2 = pneg %p879_p0 }
  0x1e   : > { %s639_s9 = scalar_lea.hbm %s1010_s2, 2048  ;;  %p640_p5 = scmp.lt.u32.totalorder %s886_s24, %s1010_s2 }
  0x1f   : > { %p637_p3 = pnand %p636_p2, %p635_p1  ;;  %p641_p6 = scmp.lt.u32.totalorder %s639_s9, %s634_s7 }
  0x20   : > { %p643_p10 = scmp.lt.u32.totalorder %s634_s7, %s886_s24 }
  0x21   : > { %p638_p4 = pneg %p637_p3  ;;  %p642_p7 = por %p641_p6, %p640_p5 }
  0x23   : > { %p644_p11 = por %p643_p10, %p642_p7 }
  0x25   : > { %p645_p13 = pnand %p644_p11, %p638_p4 }
  0x27   : > { %648 = shalt.err (!%p645_p13)
}
  0x28   : > { %s649_s5 = scalar_lea.vmem %s875_s11, 256  ;;  %s764_s20 = smov [#allocation2]  }
  0x29   : > { %p650_p1 = scmp.ne.s32.totalorder %s875_s11, %s649_s5  ;;  %s654_s25 = sshll.u32 %s764_s20, 4  ;;  %s655_s25 = int_to_ptr.vmem [resolvable:$false] %s654_s25 }
  0x2a   : > { %s656_s29 = scalar_lea.vmem %s655_s25, 512  ;;  %p657_p9 = scmp.lt.s32.totalorder %s875_s11, %s655_s25 }
  0x2b   : > { %p652_p3 = pnand %p650_p1, %p636_p2  ;;  %p658_p5 = scmp.lt.s32.totalorder %s656_s29, %s649_s5 }
  0x2d   : > { %p653_p12 = pneg %p652_p3  ;;  %p659_p6 = por %p658_p5, %p657_p9 }
  0x2f   : > { %p660_p7 = pnand %p659_p6, %p653_p12 }
  0x31   : > { %663 = shalt.err (!%p660_p7)
}
  0x32   : > { %s765_s7 = smov 128   ;;  %s766_s26 = smov 8  }
  0x33   : > { %556 = dma.hbm_to_vmem [thread:$0]  (!%p879_p0), %s886_s24, 256, %s875_s11, %s888_s30, %s765_s7, %s765_s7, %s766_s26  }
  0x34   : > { %p505_p2 = scmp.ge.s32.totalorder %s762_s19, 1  ;;  %p174_p4 = scmp.lt.s32.totalorder %s762_s19, 9 }
  0x36   : > { %p175_p10 = pnand %p505_p2, %p174_p4 }
  0x37   : > { %s919_s8 = sand.u32 (!%p175_p10), 1, %s738_s13  }
  0x38   : > { %178 = sbr.rel (%p175_p10) target bundleno = 636 (0x27c), region = 32  ;;  %s506_s9 = sshll.u32 (!%p175_p10), %s919_s8, 4 }
  0x39   : > { %s181_s23 = scalar_lea.sflag (!%p175_p10), [#allocation3], %s919_s8  ;;  %s184_s10 = scalar_lea.vmem (!%p175_p10), [#allocation2], %s506_s9 }
  0x3f   : > { %725 = dma.done.wait (%p854_p8), %s181_s23, 256  }
  0x40   : > { %727 = vsyncadd (%p854_p8), %s181_s23, 4294967040  ;;  %vm221_vm0 = vcmask 1046528   ;;  %v207_v0 = vld [vmem:[%s184_s10] sm:$0xff]  ;;  %s767_s24 = smov 127   ;;  %v230_v2 = vld [vmem:[%s1009_s1 + $0x8] sm:$0x7f] }
  0x41   : > { %v229_v1 = vld [vmem:[%s1009_s1] sm:$0xff]  ;;  %211 = vrot.lane.b32.xlu0 %v207_v0, %s767_s24  ;;  %vm768_vm1 = vmmov 1   ;;  %v208_v4 = vld [vmem:[%s184_s10 + $0x8] sm:$0xff]  ;;  %vm231_vm3 = vcmask 121856   ;;  %v769_v15 = vmov 0.0|0.0   ;;  %vm770_vm4 = vmmov 0  }
  0x42   : > { %vm934_vm2 = vmpackc.low %vm221_vm0, %vm768_vm1  ;;  %v539_v5 = vpack.c.bf16 %v230_v2, %v229_v1  ;;  %545 = vmatprep.subr.bf16.mxu1 %v769_v15  ;;  %v771_v16 = vmov 0.0   ;;  %v316_v20 = vld [vmem:[%s1008_s0] sm:$0xff]  ;;  %s507_s25 = sshll.u32 %s919_s8, 3  ;;  %s514_s29 = sshll.u32 %s750_s16, 2  ;;  %vm393_vm5 = vcmask 64512  }
  0x43   : > { %536 = vmatprep.mubr.msk.f32.mxu1 %vm770_vm4, %v771_v16  ;;  %s407_s7 = sadd.s32 %s746_s15, %s514_s29  ;;  %s206_s9 = scalar_lea.vmem [#allocation5], %s507_s25 }
  0x44   : > { %541 = vmatprep.subr.msk.bf16.mxu0 %vm934_vm2, %v539_v5  ;;  %s515_s26 = sshll.u32 %s407_s7, 7  ;;  %s411_s23 = sshll.u32 %s206_s9, 4  ;;  %s956_s23 = int_to_ptr.vmem [resolvable:$true] %s411_s23 }
  0x45   : > { %213 = vrot.lane.b32.xlu0 %v208_v4, %s767_s24  ;;  %544 = vmatpush3.bf16.msk.msra.mxu0 %vm934_vm2, %v539_v5  ;;  %s954_s21 = scalar_lea.hbm %s1011_s3, %s515_s26  ;;  %s396_s24 = scalar_lea.sflag [#allocation4], %s919_s8 }
  0x46   : > { %s664_s16 = scalar_lea.vmem %s956_s23, 128  ;;  %p1022_p9 = scmp.ne.s32.totalorder %s1017_s28, 0 }
  0x47   : > { %p665_p8 = scmp.ne.s32.totalorder %s956_s23, %s664_s16  ;;  %s772_s15 = smov [#allocation5]  }
  0x48   : > { %s668_s30 = sshll.u32 %s772_s15, 4  ;;  %s669_s30 = int_to_ptr.vmem [resolvable:$false] %s668_s30 }
  0x49   : > { %p666_p12 = pnand %p665_p8, %p1022_p9  ;;  %s670_s5 = scalar_lea.vmem %s669_s30, 256 }
  0x4a   : > { %p671_p11 = scmp.lt.s32.totalorder %s956_s23, %s669_s30  ;;  %p672_p13 = scmp.lt.s32.totalorder %s670_s5, %s664_s16 }
  0x4b   : > { %p667_p0 = pneg %p666_p12 }
  0x4c   : > { %p673_p1 = por %p672_p13, %p671_p11 }
  0x4e   : > { %p674_p3 = pnand %p673_p1, %p667_p0 }
  0xb3   : > { %v212_v6 = vpop.permute.xlu0 %211 }
  0xb4   : > { %v217_v7 = vmax.f32 %v207_v0, %v212_v6 }
  0xb6   : > { %v222_v10 = vrot.slane %v217_v7, 1 }
  0xb7   : > { %v214_v8 = vpop.permute.xlu0 %213 }
  0xb8   : > { %v218_v9 = vmax.f32 %v208_v4, %v214_v8 }
  0xba   : > { %v223_v11 = vrot.slane %v218_v9, 1 }
  0xbc   : > { %v224_v12 = vsel %vm221_vm0, %v222_v10, %v223_v11  ;;  %v228_v14 = vmax.f32 %v218_v9, %v223_v11 }
  0xbd   : > { %v227_v13 = vmax.f32 %v217_v7, %v224_v12 }
  0xbf   : > { %529 = vmatprep.mubr.msk.f32.mxu0 %vm231_vm3, %v227_v13 }
  0xc0   : > { %530 = vmatmul.mubr.msk.f32.vlgmr.msra.gmra.mrb[0].mxu0 %vm231_vm3, %v228_v14 }
 0x193   : > { %v531_v17 = vpop.f32.mrb[0].mxu0 }
 0x194   : > { %v307_v18 = vpop.f32.mrb[1].mxu0 }
 0x195   : > { %v546_v19 = vpack.c.bf16 %v531_v17, %v307_v18 }
 0x197   : > { %548 = vmatpush3.bf16.msk.msra.mxu1 %vm934_vm2, %v546_v19 }
 0x19a   : > { %537 = vmatmul.mubr.msk.f32.vlgmr.msra.gmra.mrb[0].mxu1 %vm231_vm3, %v316_v20 }
 0x26d   : > { %v389_v21 = vpop.f32.mrb[0].mxu1 }
 0x26e   : > { %394 = vst.msk [vmem:[%s206_s9] sm:$0xff] %vm393_vm5, %v389_v21  ;;  %v538_v22 = vpop.f32.mrb[1].mxu1 }
 0x26f   : > { %677 = shalt.err (!%p674_p3)
}
 0x270   : > { %s678_s8 = scalar_lea.hbm %s954_s21, 128  ;;  %s682_s25 = scalar_lea.hbm %s1011_s3, 1024 }
 0x271   : > { %p679_p5 = scmp.ne.s32.totalorder %s954_s21, %s678_s8  ;;  %p683_p2 = scmp.lt.u32.totalorder %s954_s21, %s1011_s3 }
 0x272   : > { %p684_p4 = scmp.lt.u32.totalorder %s682_s25, %s678_s8  ;;  %p686_p8 = scmp.lt.u32.totalorder %s678_s8, %s954_s21 }
 0x273   : > { %p680_p6 = pnand %p679_p5, %p1022_p9 }
 0x274   : > { %p685_p10 = por %p684_p4, %p683_p2 }
 0x275   : > { %p681_p7 = pneg %p680_p6 }
 0x276   : > { %p687_p12 = por %p686_p8, %p685_p10 }
 0x278   : > { %p688_p0 = pnand %p687_p12, %p681_p7 }
 0x27a   : > { %691 = shalt.err (!%p688_p0)
}
 0x27b   : > { %551 = dma.vmem_to_hbm [thread:$0]  (%p1022_p9), %s956_s23, 128, %s954_s21, %s396_s24  }
 0x27c PF: > { %p562_p11 = scmp.ge.s32.totalorder %s762_s19, 2  ;;  %s423_s26 = sand.u32 1, %s734_s12  }
 0x27d   : > { %p1023_p13 = scmp.ne.s32.totalorder %s1018_s4, 0  ;;  %s424_s9 = scalar_lea.sflag [#allocation4], %s423_s26 }
 0x27f   : > { %p558_p1 = pnand %p562_p11, %p1023_p13 }
 0x281   : > { %729 = dma.done.wait (!%p558_p1), %s424_s9, 128  }
 0x282   : > { %731 = vsyncadd (!%p558_p1), %s424_s9, 4294967168  ;;  %s19_s19 = sadd.s32 1, %s762_s19   ;;  %s1024_s28 = sld [smem:[#allocation8_spill]] }
 0x283   : > { %p16_p3 = scmp.ge.s32.totalorder %s19_s19, 10   ;;  %s1025_s12 = smov %s738_s13 }
 0x284   : > { %s1026_s13 = smov %s742_s14  ;;  %s1027_s14 = smov %s871_s6 }
 0x285   : > { %s1028_s15 = smov %s754_s17  ;;  %s1029_s16 = smov %s758_s18 }
 0x286   : > { %s1030_s17 = smov %s1033_s22  ;;  %18 = sbr.rel (!%p16_p3) target bundleno = 7 (0x7), region = 77 }
 0x288   : > { %s1031_s18 = smov %s1024_s28 }
 0x28d   :  { %429 = vsyncpa [#allocation3], 1 }
 0x28e   :  { %431 = vsyncpa [#allocation3 + $0x1], 1 }
 0x28f   :  { %432 = vsyncpa [#allocation4], 1 }
 0x290   :  { %434 = vsyncpa [#allocation4 + $0x1], 1 }

</bundles_post_ra>
